<compile_context>
chip_gen: v7x
topology: tpu7x:2x2x1
jax: 0.10.0
libtpu: 0.0.40
codegen_flags: <defaults>
</compile_context>

<pallas_src>
import functools

import jax
import jax.numpy as jnp
from jax.experimental import pallas as pl
from jax.experimental.pallas import tpu as pltpu


# ----------------------------------------------------------------------------
# Tiling / budget helpers
# ----------------------------------------------------------------------------
def _pick_tile(n, target, align):
    """Largest divisor of n that is a multiple of `align` and <= target; else full extent."""
    if n <= target:
        return n
    t = (target // align) * align
    while t >= align:
        if n % t == 0:
            return t
        t -= align
    # TODO(synk): extents with no aligned divisor fall back to the full extent; remainder
    # tiles / padding would be needed to tile them without blowing the VMEM budget.
    return n


def _vmem_budgets():
    """(vmem_limit ceiling, per-call block budget) derived from this generation's VMEM."""
    cap = 64 << 20                        # conservative fallback (v7x per-TC VMEM)
    try:
        info = pltpu.get_tpu_info()
        cap = int(getattr(info, "vmem_capacity_bytes", cap) or cap)
    except Exception:
        pass
    usable = (cap * 3) // 4               # 128 MiB -> 96 MiB, 64 MiB -> 48 MiB
    block_budget = max(usable - (8 << 20), usable // 2)
    return usable, block_budget


def _i_candidates(I):
    return sorted({_pick_tile(I, t, 128) for t in (I, 1024, 512, 256, 128)}, reverse=True)


def _select_masked_tiles(B, T, I, E, C, Oe, csize, osize, budget,
                         with_mask, with_gather, max_unroll):
    """Pick (e_blk, i_blk): maximize e_blk first (fewest x re-reads), then i_blk."""
    i_cands = _i_candidates(I)
    unit = C if with_gather else 1
    eb_cands = [eb for eb in range(E, 0, -1)
                if E % eb == 0
                and (not with_mask or eb == E or (eb * C) % 8 == 0)
                and eb * unit <= max(max_unroll, unit)]
    if not eb_cands:
        eb_cands = [E]
    if B == 1:  # keep >=2 parallel grid steps for v7x's 2 TensorCores when possible
        eb_cands = [eb for eb in eb_cands if E // eb >= 2] or eb_cands

    def est(eb, ib):
        b = 2 * T * ib * csize                        # x block (double buffered)
        if with_mask:
            b += 2 * eb * C * T * csize               # dispatch-mask block
        b += 2 * eb * ib * Oe * csize                 # weight block
        b += 2 * eb * Oe * 4                          # bias block (f32)
        b += 2 * eb * C * Oe * osize                  # output block
        b += eb * C * Oe * 4                          # f32 accumulator scratch
        b += eb * C * ib * (4 + csize)                # xd intermediate (f32 + compute dtype)
        if with_gather:
            b += eb * C * ib * csize                  # gather scratch
        return b

    for eb in eb_cands:
        for ib in i_cands:
            if est(eb, ib) <= budget:
                return eb, ib, est(eb, ib)
    eb, ib = eb_cands[-1], i_cands[-1]
    return eb, ib, est(eb, ib)


def _select_unmasked_tiles(T, I, O, csize, osize, budget):
    """Prefer i_blk == I (weight resident, no k axis / accumulator), then the largest t_blk."""
    t_cands = sorted({_pick_tile(T, t, 8)
                      for t in (2048, 1024, 512, 256, 128, 64, 32, 16, 8)}, reverse=True)
    i_cands = _i_candidates(I)
    i_order = [I] + [c for c in i_cands if c != I]

    def est(tb, ib):
        b = 2 * tb * ib * csize + 2 * ib * O * csize + 2 * O * 4 + 2 * tb * O * osize
        if ib != I:
            b += tb * O * 4                           # f32 accumulator scratch
        return b

    for ib in i_order:
        for tb in t_cands:
            if est(tb, ib) <= budget:
                return tb, ib, est(tb, ib)
    tb, ib = t_cands[-1], i_cands[-1]
    return tb, ib, est(tb, ib)


def _vmem_limit(usable, est_bytes):
    return int(min(usable, max(32 << 20, est_bytes + (8 << 20))))


# ----------------------------------------------------------------------------
# Kernels
# ----------------------------------------------------------------------------
def _masked_dense_kernel(x_ref, m_ref, w_ref, b_ref, o_ref, *scratch, e_blk, cap, cdt):
    # x_ref: (1, T, I_blk)   m_ref: (1, E_blk*C, T)   w_ref: (E_blk, I_blk, Oe)
    # b_ref: (E_blk, 1, Oe) f32    o_ref: (1, E_blk, C, Oe)
    # scratch: () when n_k == 1 else (acc_ref (E_blk, C, Oe) f32,)
    # Dispatch: one fat-M matmul over all experts in the block, natural MXU orientation.
    xd = jnp.dot(m_ref[0], x_ref[0], preferred_element_type=jnp.float32)
    # Exact for 0/1 one-hot masks; adds one rounding step for weighted masks when cdt=bf16.
    xd = xd.astype(cdt)

    if not scratch:                                   # n_k == 1: write straight through
        for e in range(e_blk):
            o_ref[0, e] = (jnp.dot(xd[e * cap:(e + 1) * cap], w_ref[e],
                                   preferred_element_type=jnp.float32)
                           + b_ref[e]).astype(o_ref.dtype)
    else:
        acc_ref, = scratch
        k = pl.program_id(2)

        @pl.when(k == 0)
        def _init():
            acc_ref[...] = jnp.zeros_like(acc_ref)

        for e in range(e_blk):
            acc_ref[e] += jnp.dot(xd[e * cap:(e + 1) * cap], w_ref[e],
                                  preferred_element_type=jnp.float32)

        @pl.when(k == pl.num_programs(2) - 1)
        def _finalize():
            o_ref[0] = (acc_ref[...] + b_ref[...]).astype(o_ref.dtype)


def _masked_gather_kernel(idx_ref, x_ref, w_ref, b_ref, o_ref, xg_ref, *scratch,
                          e_blk, cap, n_experts, cdt):
    # idx_ref: (B*E*C,) int32 in SMEM (scalar prefetch)    x_ref: (1, T, I_blk)
    # w_ref: (E_blk, I_blk, Oe)  b_ref: (E_blk, 1, Oe) f32  o_ref: (1, E_blk, C, Oe)
    # xg_ref: (E_blk*C, I_blk) gather scratch; optional acc (E_blk, C, Oe) f32 when n_k > 1.
    b = pl.program_id(0)
    eg0 = pl.program_id(1) * e_blk
    # Gather the C selected token rows per expert (replaces the dense dispatch matmul).
    for e in range(e_blk):
        for c in range(cap):
            t_idx = idx_ref[(b * n_experts + eg0 + e) * cap + c]
            xg_ref[pl.ds(e * cap + c, 1), :] = x_ref[0, pl.ds(t_idx, 1), :]
    xd = xg_ref[...]

    if not scratch:                                   # n_k == 1: write straight through
        for e in range(e_blk):
            o_ref[0, e] = (jnp.dot(xd[e * cap:(e + 1) * cap], w_ref[e],
                                   preferred_element_type=jnp.float32)
                           + b_ref[e]).astype(o_ref.dtype)
    else:
        acc_ref, = scratch
        k = pl.program_id(2)

        @pl.when(k == 0)
        def _init():
            acc_ref[...] = jnp.zeros_like(acc_ref)

        for e in range(e_blk):
            acc_ref[e] += jnp.dot(xd[e * cap:(e + 1) * cap], w_ref[e],
                                  preferred_element_type=jnp.float32)

        @pl.when(k == pl.num_programs(2) - 1)
        def _finalize():
            o_ref[0] = (acc_ref[...] + b_ref[...]).astype(o_ref.dtype)


def _unmasked_kernel(x_ref, w_ref, b_ref, o_ref, *scratch):
    # x_ref: (1, T_blk, I_blk)  w_ref: (I_blk, O)  b_ref: (1, O) f32  o_ref: (1, T_blk, O)
    if not scratch:                                   # n_k == 1: single fat matmul + bias
        o_ref[0] = (jnp.dot(x_ref[0], w_ref[...], preferred_element_type=jnp.float32)
                    + b_ref[...]).astype(o_ref.dtype)
    else:
        acc_ref, = scratch
        k = pl.program_id(2)

        @pl.when(k == 0)
        def _init():
            acc_ref[...] = jnp.zeros_like(acc_ref)

        acc_ref[...] += jnp.dot(x_ref[0], w_ref[...], preferred_element_type=jnp.float32)

        @pl.when(k == pl.num_programs(2) - 1)
        def _finalize():
            o_ref[0] = (acc_ref[...] + b_ref[...]).astype(o_ref.dtype)


# ----------------------------------------------------------------------------
# Wrapper
# ----------------------------------------------------------------------------
def experts_choose_masked_contract(x, weight, bias, dispatch_mask=None, *,
                                   dispatch_indices=None, compute_dtype=jnp.bfloat16):
    """Pallas implementation of ExpertsChooseMaskedContract.forward.

    dispatch_indices: optional (B, E, C) int32 token indices — one-hot fast path that skips
    the dense dispatch matmul (valid when dispatch_mask[b,t,e,c] == (t == indices[b,e,c])).
    """
    B, T, I = x.shape
    E, Oe, _ = weight.shape
    O = E * Oe
    out_dtype = x.dtype
    cdt = compute_dtype
    csize = jnp.dtype(cdt).itemsize
    osize = jnp.dtype(out_dtype).itemsize
    usable_vmem, block_budget = _vmem_budgets()

    if bias is None:
        bias = jnp.zeros((E, Oe), dtype=jnp.float32)

    xc = x.astype(cdt)                                     # (B, T, I)

    # ------------------------------- unmasked -------------------------------
    if dispatch_mask is None and dispatch_indices is None:
        w_full_t = weight.reshape(O, I).T.astype(cdt)      # (I, O): lane-dense output
        bias2 = bias.reshape(1, O).astype(jnp.float32)

        t_blk, i_blk, est_bytes = _select_unmasked_tiles(T, I, O, csize, osize, block_budget)
        n_t, n_k = T // t_blk, I // i_blk
        scratch = [] if n_k == 1 else [pltpu.VMEM((t_blk, O), jnp.float32)]
        cost = pl.CostEstimate(
            flops=2 * B * T * I * O, transcendentals=0,
            bytes_accessed=B * T * I * csize + n_t * I * O * csize + B * T * O * osize)

        y = pl.pallas_call(
            _unmasked_kernel,
            out_shape=jax.ShapeDtypeStruct((B, T, O), out_dtype),
            grid_spec=pltpu.PrefetchScalarGridSpec(
                num_scalar_prefetch=0,
                grid=(B, n_t, n_k),
                in_specs=[
                    pl.BlockSpec((1, t_blk, i_blk), lambda b, t, k: (b, t, k)),
                    pl.BlockSpec((i_blk, O), lambda b, t, k: (k, 0)),
                    pl.BlockSpec((1, O), lambda b, t, k: (0, 0)),
                ],
                out_specs=pl.BlockSpec((1, t_blk, O), lambda b, t, k: (b, t, 0)),
                scratch_shapes=scratch),
            compiler_params=pltpu.CompilerParams(
                dimension_semantics=("parallel", "parallel", "arbitrary"),
                vmem_limit_bytes=_vmem_limit(usable_vmem, est_bytes)),
            cost_estimate=cost,
        )(xc, w_full_t, bias2)
        # Layout plumbing back to the module's (B, E, T, Oe) output.
        return jnp.transpose(y.reshape(B, T, E, Oe), (0, 2, 1, 3))

    # ------------------- masked: shared weight / bias layout ----------------
    w_t = jnp.transpose(weight, (0, 2, 1)).astype(cdt)     # (E, I, Oe)  K-major
    bias3 = bias.reshape(E, 1, Oe).astype(jnp.float32)     # (E, 1, Oe)

    # ------------------------- one-hot gather fast path ---------------------
    if dispatch_indices is not None:
        C = dispatch_indices.shape[-1]
        idx = dispatch_indices.reshape(-1).astype(jnp.int32)   # (B*E*C,) -> SMEM
        e_blk, i_blk, est_bytes = _select_masked_tiles(
            B, T, I, E, C, Oe, csize, osize, block_budget,
            with_mask=False, with_gather=True, max_unroll=256)
        n_e, n_k = E // e_blk, I // i_blk
        scratch = [pltpu.VMEM((e_blk * C, i_blk), cdt)]
        if n_k > 1:
            scratch.append(pltpu.VMEM((e_blk, C, Oe), jnp.float32))
        kernel = functools.partial(_masked_gather_kernel, e_blk=e_blk, cap=C,
                                   n_experts=E, cdt=cdt)
        cost = pl.CostEstimate(
            flops=2 * B * E * C * I * Oe, transcendentals=0,
            bytes_accessed=(B * n_e * T * I * csize + B * E * I * Oe * csize
                            + B * E * C * Oe * osize + B * E * C * 4))

        return pl.pallas_call(
            kernel,
            out_shape=jax.ShapeDtypeStruct((B, E, C, Oe), out_dtype),
            grid_spec=pltpu.PrefetchScalarGridSpec(
                num_scalar_prefetch=1,
                grid=(B, n_e, n_k),
                in_specs=[
                    pl.BlockSpec((1, T, i_blk), lambda b, e, k, idx_ref: (b, 0, k)),
                    pl.BlockSpec((e_blk, i_blk, Oe), lambda b, e, k, idx_ref: (e, k, 0)),
                    pl.BlockSpec((e_blk, 1, Oe), lambda b, e, k, idx_ref: (e, 0, 0)),
                ],
                out_specs=pl.BlockSpec((1, e_blk, C, Oe),
                                       lambda b, e, k, idx_ref: (b, e, 0, 0)),
                scratch_shapes=scratch),
            compiler_params=pltpu.CompilerParams(
                dimension_semantics=("parallel", "parallel", "arbitrary"),
                vmem_limit_bytes=_vmem_limit(usable_vmem, est_bytes)),
            cost_estimate=cost,
        )(idx, xc, w_t, bias3)

    # ------------------- general dense dispatch-mask path -------------------
    C = dispatch_mask.shape[-1]
    # (B,T,E,C) -> (B,E,C,T) -> (B, E*C, T): lane-dense T, natural (M,K)x(K,N) dispatch.
    mask_ct = jnp.transpose(dispatch_mask.astype(cdt), (0, 2, 3, 1)).reshape(B, E * C, T)

    e_blk, i_blk, est_bytes = _select_masked_tiles(
        B, T, I, E, C, Oe, csize, osize, block_budget,
        with_mask=True, with_gather=False, max_unroll=32)
    n_e, n_k = E // e_blk, I // i_blk
    scratch = [] if n_k == 1 else [pltpu.VMEM((e_blk, C, Oe), jnp.float32)]
    kernel = functools.partial(_masked_dense_kernel, e_blk=e_blk, cap=C, cdt=cdt)
    cost = pl.CostEstimate(
        flops=2 * B * E * C * T * I + 2 * B * E * C * I * Oe, transcendentals=0,
        bytes_accessed=(B * n_e * T * I * csize + B * E * C * T * csize
                        + B * E * I * Oe * csize + B * E * C * Oe * osize))

    return pl.pallas_call(
        kernel,
        out_shape=jax.ShapeDtypeStruct((B, E, C, Oe), out_dtype),
        grid_spec=pltpu.PrefetchScalarGridSpec(
            num_scalar_prefetch=0,
            grid=(B, n_e, n_k),
            in_specs=[
                pl.BlockSpec((1, T, i_blk), lambda b, e, k: (b, 0, k)),
                pl.BlockSpec((1, e_blk * C, T), lambda b, e, k: (b, e, 0)),
                pl.BlockSpec((e_blk, i_blk, Oe), lambda b, e, k: (e, k, 0)),
                pl.BlockSpec((e_blk, 1, Oe), lambda b, e, k: (e, 0, 0)),
            ],
            out_specs=pl.BlockSpec((1, e_blk, C, Oe), lambda b, e, k: (b, e, 0, 0)),
            scratch_shapes=scratch),
        compiler_params=pltpu.CompilerParams(
            dimension_semantics=("parallel", "parallel", "arbitrary"),
            vmem_limit_bytes=_vmem_limit(usable_vmem, est_bytes)),
        cost_estimate=cost,
    )(xc, mask_ct, w_t, bias3)


# ----------------------------------------------------------------------------
# Self-test
# ----------------------------------------------------------------------------
if __name__ == "__main__":
    key = jax.random.PRNGKey(0)
    B, T = 2, 8
    in_features, out_features, num_experts, capacity = 32, 64, 4, 4
    Oe = out_features // num_experts

    k1, k2, k3, k4 = jax.random.split(key, 4)
    x = jax.random.normal(k1, (B, T, in_features), dtype=jnp.float32)

    # Deterministic nn.Linear-style init: U(-1/sqrt(in), 1/sqrt(in)) for weight and bias.
    bound = 1.0 / (in_features ** 0.5)
    linear_w = jax.random.uniform(k2, (out_features, in_features),
                                  minval=-bound, maxval=bound, dtype=jnp.float32)
    linear_b = jax.random.uniform(k3, (out_features,),
                                  minval=-bound, maxval=bound, dtype=jnp.float32)
    weight = linear_w.reshape(num_experts, Oe, in_features)   # (E, O_e, I)
    bias = linear_b.reshape(num_experts, Oe)                  # (E, O_e)

    # Experts-choose dispatch: one-hot over tokens for each (batch, expert, slot).
    tok = jax.random.randint(k4, (B, num_experts, capacity), 0, T)          # (B, E, C)
    dispatch_mask = jnp.transpose(jax.nn.one_hot(tok, T, dtype=jnp.float32),
                                  (0, 3, 1, 2))                             # (B, T, E, C)

    # Pure-JAX references (same semantics as the PyTorch forward), full f32 precision.
    hi = jax.lax.Precision.HIGHEST
    ref_masked = jnp.einsum('bti,btec,eoi->beco', x, dispatch_mask, weight,
                            precision=hi) + bias[None, :, None, :]
    ref_unmasked = jnp.einsum('bti,eoi->beto', x, weight,
                              precision=hi) + bias[None, :, None, :]

    # f32 MXU-input paths.
    out_dense_f32 = experts_choose_masked_contract(x, weight, bias, dispatch_mask,
                                                   compute_dtype=jnp.float32)
    out_gather_f32 = experts_choose_masked_contract(x, weight, bias,
                                                    dispatch_indices=tok,
                                                    compute_dtype=jnp.float32)
    out_unm_f32 = experts_choose_masked_contract(x, weight, bias,
                                                 compute_dtype=jnp.float32)
    # Default bf16 MXU-input / f32-accumulate paths.
    out_dense_bf16 = experts_choose_masked_contract(x, weight, bias, dispatch_mask)
    out_gather_bf16 = experts_choose_masked_contract(x, weight, bias, dispatch_indices=tok)
    out_unm_bf16 = experts_choose_masked_contract(x, weight, bias)

    jax.block_until_ready((out_dense_f32, out_gather_f32, out_unm_f32,
                           out_dense_bf16, out_gather_bf16, out_unm_bf16))

    assert out_dense_f32.shape == (B, num_experts, capacity, Oe)
    assert out_gather_f32.shape == (B, num_experts, capacity, Oe)
    assert out_unm_f32.shape == (B, num_experts, T, Oe)
    assert jnp.allclose(out_dense_f32, ref_masked, atol=5e-3, rtol=5e-3)
    assert jnp.allclose(out_gather_f32, ref_masked, atol=5e-3, rtol=5e-3)
    assert jnp.allclose(out_unm_f32, ref_unmasked, atol=5e-3, rtol=5e-3)
    assert jnp.allclose(out_dense_bf16, ref_masked, atol=2e-2, rtol=2e-2)
    assert jnp.allclose(out_gather_bf16, ref_masked, atol=2e-2, rtol=2e-2)
    assert jnp.allclose(out_unm_bf16, ref_unmasked, atol=2e-2, rtol=2e-2)
    print("KERNEL_OK")
</pallas_src>

<mosaic_0001>
module attributes {stable_mosaic.version = 11 : i64} {
  func.func @_masked_dense_kernel(%arg0: i32, %arg1: i32, %arg2: i32, %arg3: memref<1x8x32xf32, #tpu.memory_space<vmem>>, %arg4: memref<1x16x8xf32, #tpu.memory_space<vmem>>, %arg5: memref<4x32x16xf32, #tpu.memory_space<vmem>>, %arg6: memref<4x1x16xf32, #tpu.memory_space<vmem>>, %arg7: memref<1x4x4x16xf32, #tpu.memory_space<vmem>>) attributes {dimension_semantics = [#tpu.dimension_semantics<parallel>, #tpu.dimension_semantics<parallel>, #tpu.dimension_semantics<arbitrary>], iteration_bounds = array<i64: 2, 1, 1>, scalar_prefetch = 0 : i64, scratch_operands = 0 : i64, tpu.core_type = #tpu.core_type<tc>, window_params = [{transform_indices = @transform_0, window_bounds = array<i64: 1, 8, 32>}, {transform_indices = @transform_1, window_bounds = array<i64: 1, 16, 8>}, {transform_indices = @transform_2, window_bounds = array<i64: 4, 32, 16>}, {transform_indices = @transform_3, window_bounds = array<i64: 4, 1, 16>}, {transform_indices = @transform_4, window_bounds = array<i64: 1, 4, 4, 16>}]} {
    %c0 = arith.constant 0 : index
    %c0_0 = arith.constant 0 : index
    %c0_1 = arith.constant 0 : index
    %0 = vector.load %arg4[%c0, %c0_0, %c0_1] : memref<1x16x8xf32, #tpu.memory_space<vmem>>, vector<1x16x8xf32>
    %1 = vector.shape_cast %0 : vector<1x16x8xf32> to vector<16x8xf32>
    %c0_2 = arith.constant 0 : index
    %c0_3 = arith.constant 0 : index
    %c0_4 = arith.constant 0 : index
    %2 = vector.load %arg3[%c0_2, %c0_3, %c0_4] : memref<1x8x32xf32, #tpu.memory_space<vmem>>, vector<1x8x32xf32>
    %3 = vector.shape_cast %2 : vector<1x8x32xf32> to vector<8x32xf32>
    %cst = arith.constant dense<0.000000e+00> : vector<16x32xf32>
    %4 = tpu.matmul %1, %3, %cst {dimension_numbers = #tpu.dot_dimension_numbers<[1], [0], [0], [1], [0, 0, 1, 1], [], []>} : vector<16x8xf32>, vector<8x32xf32>, vector<16x32xf32> -> vector<16x32xf32>
    %5 = vector.extract_strided_slice %4 {offsets = [0, 0], sizes = [4, 32], strides = [1, 1]} : vector<16x32xf32> to vector<4x32xf32>
    %c0_5 = arith.constant 0 : index
    %c0_6 = arith.constant 0 : index
    %c0_7 = arith.constant 0 : index
    %6 = vector.load %arg5[%c0_5, %c0_6, %c0_7] : memref<4x32x16xf32, #tpu.memory_space<vmem>>, vector<1x32x16xf32>
    %7 = vector.shape_cast %6 : vector<1x32x16xf32> to vector<32x16xf32>
    %cst_8 = arith.constant dense<0.000000e+00> : vector<4x16xf32>
    %8 = tpu.matmul %5, %7, %cst_8 {dimension_numbers = #tpu.dot_dimension_numbers<[1], [0], [0], [1], [0, 0, 1, 1], [], []>} : vector<4x32xf32>, vector<32x16xf32>, vector<4x16xf32> -> vector<4x16xf32>
    %c0_9 = arith.constant 0 : index
    %c0_10 = arith.constant 0 : index
    %c0_11 = arith.constant 0 : index
    %9 = vector.load %arg6[%c0_9, %c0_10, %c0_11] : memref<4x1x16xf32, #tpu.memory_space<vmem>>, vector<1x1x16xf32>
    %10 = vector.shape_cast %9 : vector<1x1x16xf32> to vector<1x16xf32>
    %11 = vector.broadcast %10 : vector<1x16xf32> to vector<4x16xf32>
    %12 = arith.addf %8, %11 : vector<4x16xf32>
    %c0_12 = arith.constant 0 : index
    %c0_13 = arith.constant 0 : index
    %c0_14 = arith.constant 0 : index
    %c0_15 = arith.constant 0 : index
    %13 = vector.load %arg7[%c0_12, %c0_13, %c0_14, %c0_15] : memref<1x4x4x16xf32, #tpu.memory_space<vmem>>, vector<1x1x4x16xf32>
    %14 = vector.shape_cast %13 : vector<1x1x4x16xf32> to vector<4x16xf32>
    %15 = vector.shape_cast %12 : vector<4x16xf32> to vector<1x1x4x16xf32>
    tpu.vector_store %arg7[%c0_12, %c0_13, %c0_14, %c0_15], %15 {strides = array<i32>} : memref<1x4x4x16xf32, #tpu.memory_space<vmem>>, vector<1x1x4x16xf32>,
    %16 = vector.extract_strided_slice %4 {offsets = [4, 0], sizes = [4, 32], strides = [1, 1]} : vector<16x32xf32> to vector<4x32xf32>
    %c1 = arith.constant 1 : index
    %c0_16 = arith.constant 0 : index
    %c0_17 = arith.constant 0 : index
    %17 = vector.load %arg5[%c1, %c0_16, %c0_17] : memref<4x32x16xf32, #tpu.memory_space<vmem>>, vector<1x32x16xf32>
    %18 = vector.shape_cast %17 : vector<1x32x16xf32> to vector<32x16xf32>
    %cst_18 = arith.constant dense<0.000000e+00> : vector<4x16xf32>
    %19 = tpu.matmul %16, %18, %cst_18 {dimension_numbers = #tpu.dot_dimension_numbers<[1], [0], [0], [1], [0, 0, 1, 1], [], []>} : vector<4x32xf32>, vector<32x16xf32>, vector<4x16xf32> -> vector<4x16xf32>
    %c1_19 = arith.constant 1 : index
    %c0_20 = arith.constant 0 : index
    %c0_21 = arith.constant 0 : index
    %20 = vector.load %arg6[%c1_19, %c0_20, %c0_21] : memref<4x1x16xf32, #tpu.memory_space<vmem>>, vector<1x1x16xf32>
    %21 = vector.shape_cast %20 : vector<1x1x16xf32> to vector<1x16xf32>
    %22 = vector.broadcast %21 : vector<1x16xf32> to vector<4x16xf32>
    %23 = arith.addf %19, %22 : vector<4x16xf32>
    %c0_22 = arith.constant 0 : index
    %c1_23 = arith.constant 1 : index
    %c0_24 = arith.constant 0 : index
    %c0_25 = arith.constant 0 : index
    %24 = vector.load %arg7[%c0_22, %c1_23, %c0_24, %c0_25] : memref<1x4x4x16xf32, #tpu.memory_space<vmem>>, vector<1x1x4x16xf32>
    %25 = vector.shape_cast %24 : vector<1x1x4x16xf32> to vector<4x16xf32>
    %26 = vector.shape_cast %23 : vector<4x16xf32> to vector<1x1x4x16xf32>
    tpu.vector_store %arg7[%c0_22, %c1_23, %c0_24, %c0_25], %26 {strides = array<i32>} : memref<1x4x4x16xf32, #tpu.memory_space<vmem>>, vector<1x1x4x16xf32>,
    %27 = vector.extract_strided_slice %4 {offsets = [8, 0], sizes = [4, 32], strides = [1, 1]} : vector<16x32xf32> to vector<4x32xf32>
    %c2 = arith.constant 2 : index
    %c0_26 = arith.constant 0 : index
    %c0_27 = arith.constant 0 : index
    %28 = vector.load %arg5[%c2, %c0_26, %c0_27] : memref<4x32x16xf32, #tpu.memory_space<vmem>>, vector<1x32x16xf32>
    %29 = vector.shape_cast %28 : vector<1x32x16xf32> to vector<32x16xf32>
    %cst_28 = arith.constant dense<0.000000e+00> : vector<4x16xf32>
    %30 = tpu.matmul %27, %29, %cst_28 {dimension_numbers = #tpu.dot_dimension_numbers<[1], [0], [0], [1], [0, 0, 1, 1], [], []>} : vector<4x32xf32>, vector<32x16xf32>, vector<4x16xf32> -> vector<4x16xf32>
    %c2_29 = arith.constant 2 : index
    %c0_30 = arith.constant 0 : index
    %c0_31 = arith.constant 0 : index
    %31 = vector.load %arg6[%c2_29, %c0_30, %c0_31] : memref<4x1x16xf32, #tpu.memory_space<vmem>>, vector<1x1x16xf32>
    %32 = vector.shape_cast %31 : vector<1x1x16xf32> to vector<1x16xf32>
    %33 = vector.broadcast %32 : vector<1x16xf32> to vector<4x16xf32>
    %34 = arith.addf %30, %33 : vector<4x16xf32>
    %c0_32 = arith.constant 0 : index
    %c2_33 = arith.constant 2 : index
    %c0_34 = arith.constant 0 : index
    %c0_35 = arith.constant 0 : index
    %35 = vector.load %arg7[%c0_32, %c2_33, %c0_34, %c0_35] : memref<1x4x4x16xf32, #tpu.memory_space<vmem>>, vector<1x1x4x16xf32>
    %36 = vector.shape_cast %35 : vector<1x1x4x16xf32> to vector<4x16xf32>
    %37 = vector.shape_cast %34 : vector<4x16xf32> to vector<1x1x4x16xf32>
    tpu.vector_store %arg7[%c0_32, %c2_33, %c0_34, %c0_35], %37 {strides = array<i32>} : memref<1x4x4x16xf32, #tpu.memory_space<vmem>>, vector<1x1x4x16xf32>,
    %38 = vector.extract_strided_slice %4 {offsets = [12, 0], sizes = [4, 32], strides = [1, 1]} : vector<16x32xf32> to vector<4x32xf32>
    %c3 = arith.constant 3 : index
    %c0_36 = arith.constant 0 : index
    %c0_37 = arith.constant 0 : index
    %39 = vector.load %arg5[%c3, %c0_36, %c0_37] : memref<4x32x16xf32, #tpu.memory_space<vmem>>, vector<1x32x16xf32>
    %40 = vector.shape_cast %39 : vector<1x32x16xf32> to vector<32x16xf32>
    %cst_38 = arith.constant dense<0.000000e+00> : vector<4x16xf32>
    %41 = tpu.matmul %38, %40, %cst_38 {dimension_numbers = #tpu.dot_dimension_numbers<[1], [0], [0], [1], [0, 0, 1, 1], [], []>} : vector<4x32xf32>, vector<32x16xf32>, vector<4x16xf32> -> vector<4x16xf32>
    %c3_39 = arith.constant 3 : index
    %c0_40 = arith.constant 0 : index
    %c0_41 = arith.constant 0 : index
    %42 = vector.load %arg6[%c3_39, %c0_40, %c0_41] : memref<4x1x16xf32, #tpu.memory_space<vmem>>, vector<1x1x16xf32>
    %43 = vector.shape_cast %42 : vector<1x1x16xf32> to vector<1x16xf32>
    %44 = vector.broadcast %43 : vector<1x16xf32> to vector<4x16xf32>
    %45 = arith.addf %41, %44 : vector<4x16xf32>
    %c0_42 = arith.constant 0 : index
    %c3_43 = arith.constant 3 : index
    %c0_44 = arith.constant 0 : index
    %c0_45 = arith.constant 0 : index
    %46 = vector.load %arg7[%c0_42, %c3_43, %c0_44, %c0_45] : memref<1x4x4x16xf32, #tpu.memory_space<vmem>>, vector<1x1x4x16xf32>
    %47 = vector.shape_cast %46 : vector<1x1x4x16xf32> to vector<4x16xf32>
    %48 = vector.shape_cast %45 : vector<4x16xf32> to vector<1x1x4x16xf32>
    tpu.vector_store %arg7[%c0_42, %c3_43, %c0_44, %c0_45], %48 {strides = array<i32>} : memref<1x4x4x16xf32, #tpu.memory_space<vmem>>, vector<1x1x4x16xf32>,
    return
  }
  func.func @transform_0(%arg0: i32, %arg1: i32, %arg2: i32) -> (i32, i32, i32) {
    %c0_i32 = arith.constant 0 : i32
    %c0_i32_0 = arith.constant 0 : i32
    return %arg0, %c0_i32, %arg2 : i32, i32, i32
  }
  func.func @transform_1(%arg0: i32, %arg1: i32, %arg2: i32) -> (i32, i32, i32) {
    %c0_i32 = arith.constant 0 : i32
    %c0_i32_0 = arith.constant 0 : i32
    return %arg0, %arg1, %c0_i32 : i32, i32, i32
  }
  func.func @transform_2(%arg0: i32, %arg1: i32, %arg2: i32) -> (i32, i32, i32) {
    %c0_i32 = arith.constant 0 : i32
    %c0_i32_0 = arith.constant 0 : i32
    return %arg1, %arg2, %c0_i32 : i32, i32, i32
  }
  func.func @transform_3(%arg0: i32, %arg1: i32, %arg2: i32) -> (i32, i32, i32) {
    %c0_i32 = arith.constant 0 : i32
    %c0_i32_0 = arith.constant 0 : i32
    %c0_i32_1 = arith.constant 0 : i32
    return %arg1, %c0_i32, %c0_i32_0 : i32, i32, i32
  }
  func.func @transform_4(%arg0: i32, %arg1: i32, %arg2: i32) -> (i32, i32, i32, i32) {
    %c0_i32 = arith.constant 0 : i32
    %c0_i32_0 = arith.constant 0 : i32
    %c0_i32_1 = arith.constant 0 : i32
    return %arg0, %arg1, %c0_i32, %c0_i32_0 : i32, i32, i32, i32
  }
}

</mosaic_0001>

<bundles_post_ra>
// kernel: tpu_custom_call.1
= control target key start
LH: loop header
LB: loop body
LE: loop exit
PB: predicated region body
PF: predicated region fallthrough
CT: control target
= control target key end

     0   :  { %9 = vsyncpa [#allocation3], 0  ;;  %s1407_s0 = inlined_call_operand.vmem [shape: f32[2,8,32], index: 0, kind: input, shape index: {}]   ;;  %s1408_s1 = inlined_call_operand.vmem [shape: f32[2,16,8], index: 1, kind: input, shape index: {}]   ;;  %s1409_s2 = inlined_call_operand.vmem [shape: f32[4,32,16], index: 2, kind: input, shape index: {}]   ;;  %s1410_s3 = inlined_call_operand.vmem [shape: f32[4,1,16], index: 3, kind: input, shape index: {}]   ;;  %s1411_s4 = inlined_call_operand.hbm [shape: f32[2,4,4,16], index: 4, kind: output, shape index: {}]  }
   0x1   :  { %11 = vsyncpa [#allocation3 + $0x1], 0  ;;  %s1217_s15 = smov 0   ;;  %s1219_s16 = smov 0  }
   0x2   :  { %s1221_s17 = smov 0   ;;  %s1223_s18 = smov 0  }
   0x3   :  { %s1225_s19 = smov 0   ;;  %s1227_s20 = smov 0  }
   0x4 LB: > { %s904_s21 = sadd.s32 4294967295, %s1184_s20   ;;  %s905_s22 = sadd.s32 4294967294, %s1184_s20   ;;  %s1184_s20 = sphi %s1227_s20, %s17_s20   ;;  %s1180_s19 = sphi %s1225_s19, %s1418_s19   ;;  %s1176_s18 = sphi %s1223_s18, %s1417_s18   ;;  %s1172_s17 = sphi %s1221_s17, %s1416_s17   ;;  %s1168_s16 = sphi %s1219_s16, %s1415_s16   ;;  %s1164_s15 = sphi %s1217_s15, %s1414_s15  }
   0x5   : > { %s36_s23 = sadd.s32 1, %s1180_s19  ;;  %s155_s24 = sadd.s32 1, %s1172_s17 }
   0x6   : > { %p38_p0 = scmp.ge.s32.totalorder %s36_s23, 2  ;;  %p165_p1 = scmp.ne.s32.totalorder %s1172_s17, %s1168_s16 }
   0x7   : > { %p166_p2 = scmp.eq.s32.totalorder %s904_s21, 1  ;;  %p171_p3 = scmp.ne.s32.totalorder %s1168_s16, %s1164_s15 }
   0x8   : > { %s1420_s23 = smov (%p38_p0, %s36_s23), 0  ;;  %p172_p5 = scmp.eq.s32.totalorder %s905_s22, 1 }
   0x9   : > { %p1257_p4 = por %p166_p2, %p165_p1  ;;  %s150_s26 = ssub.s32 %s1180_s19, %s1420_s23 }
   0xa   : > { %p910_p6 = scmp.ge.s32.totalorder %s1184_s20, 1  ;;  %p153_p7 = scmp.eq.s32.totalorder %s150_s26, 0 }
   0xb   : > { %p1264_p8 = por %p172_p5, %p171_p3  ;;  %p236_p9 = scmp.lt.s32.totalorder %s1184_s20, 3 }
   0xc   : > { %s1270_s28 = scalar_select %p153_p7, %s1172_s17, %s155_s24  }
   0xd   : > { %p237_p10 = pnand %p910_p6, %p236_p9 }
   0xe   : > { %p287_p11 = scmp.lt.s32.totalorder (!%p237_p10), %s1176_s18, 1  ;;  %v407_v0 = vld [vmem:[%s1409_s2] sm:$0xff] (!%p237_p10)  ;;  %v408_v1 = vld [vmem:[%s1409_s2 + $0x8] sm:$0xff] (!%p237_p10)  ;;  %v1186_v2 = vmov (!%p237_p10), 0.0|0.0   ;;  %v409_v4 = vld [vmem:[%s1409_s2 + $0x10] sm:$0xff] (!%p237_p10)  ;;  %vm325_vm0 = vcmask (!%p237_p10), 64512  }
   0xf   : > { %240 = sbr.rel (%p237_p10) target bundleno = 481 (0x1e1), region = 36  ;;  %1022 = vmatprep.subr.bf16.mxu1 (!%p237_p10), %v1186_v2  ;;  %v1023_v3 = vpack.c.bf16 (!%p237_p10), %v408_v1, %v407_v0  ;;  %v410_v5 = vld [vmem:[%s1409_s2 + $0x18] sm:$0xff] (!%p237_p10)  ;;  %v919_v6 = vld [vmem:[%s1409_s2 + $0x20] sm:$0xff] (!%p237_p10)  ;;  %v920_v7 = vld [vmem:[%s1409_s2 + $0x28] sm:$0xff] (!%p237_p10)  ;;  %vm1187_vm1 = vmmov (!%p237_p10), 0   ;;  %v1188_v16 = vmov (!%p237_p10), 0.0  }
  0x10   : > { %v1026_v8 = vpack.c.bf16 (!%p237_p10), %v410_v5, %v409_v4  ;;  %v1029_v12 = vpack.c.bf16 (!%p237_p10), %v920_v7, %v919_v6  ;;  %v921_v13 = vld [vmem:[%s1409_s2 + $0x30] sm:$0xff] (!%p237_p10)  ;;  %v922_v14 = vld [vmem:[%s1409_s2 + $0x38] sm:$0xff] (!%p237_p10)  ;;  %986 = vmatprep.mubr.msk.f32.mxu1 (!%p237_p10), %vm1187_vm1, %v1188_v16  ;;  %v927_v17 = vld [vmem:[%s1409_s2 + $0x40] sm:$0xff] (!%p237_p10)  ;;  %vm418_vm2 = vcmask (!%p237_p10), 261120   ;;  %s284_s12 = sand.u32 (!%p237_p10), 1, %s1168_s16   ;;  %vm492_vm3 = vcmask (!%p237_p10), 125952  }
  0x11   : > { %1024 = vmatpush3.bf16.msra.mxu1 (!%p237_p10), %v1023_v3  ;;  %v1032_v15 = vpack.c.bf16 (!%p237_p10), %v922_v14, %v921_v13  ;;  %v928_v18 = vld [vmem:[%s1409_s2 + $0x48] sm:$0xff] (!%p237_p10)  ;;  %v935_v19 = vld [vmem:[%s1409_s2 + $0x60] sm:$0xff] (!%p237_p10)  ;;  %v929_v23 = vld [vmem:[%s1409_s2 + $0x50] sm:$0xff] (!%p237_p10)  ;;  %s911_s13 = sshll.u32 (!%p237_p10), %s284_s12, 4  ;;  %s949_s6 = sshll.u32 (!%p237_p10), %s1176_s18, 8 }
  0x12   : > { %1025 = vmatprep.subr.bf16.mxu1 (!%p237_p10), %v1186_v2  ;;  %v936_v20 = vld [vmem:[%s1409_s2 + $0x68] sm:$0xff] (!%p237_p10)  ;;  %v1035_v21 = vpack.c.bf16 (!%p237_p10), %v928_v18, %v927_v17  ;;  %v930_v24 = vld [vmem:[%s1409_s2 + $0x58] sm:$0xff] (!%p237_p10)  ;;  %v937_v28 = vld [vmem:[%s1409_s2 + $0x70] sm:$0xff] (!%p237_p10)  ;;  %s286_s26 = scalar_lea.vmem (!%p237_p10), [#allocation2], %s911_s13  ;;  %s1189_s14 = smov (!%p237_p10), [#allocation2]  }
  0x13   : > { %v1041_v26 = vpack.c.bf16 (!%p237_p10), %v936_v20, %v935_v19  ;;  %v938_v29 = vld [vmem:[%s1409_s2 + $0x78] sm:$0xff] (!%p237_p10)  ;;  %v1038_v30 = vpack.c.bf16 (!%p237_p10), %v930_v24, %v929_v23  ;;  %v917_v33 = vld [vmem:[%s1410_s3] ss:$0 sm:$0xff] (!%p237_p10)  ;;  %v924_v35 = vld [vmem:[%s1410_s3 + $0x1] ss:$0 sm:$0xff] (!%p237_p10)  ;;  %s774_s5 = sshll.u32 (!%p237_p10), %s286_s26, 4  ;;  %s1352_s5 = int_to_ptr.vmem [resolvable:$true] %s774_s5 }
  0x14   : > { %v1044_v31 = vpack.c.bf16 (!%p237_p10), %v938_v29, %v937_v28  ;;  %v932_v41 = vld [vmem:[%s1410_s3 + $0x2] ss:$0 sm:$0xff] (!%p237_p10)  ;;  %v940_v43 = vld [vmem:[%s1410_s3 + $0x3] ss:$0 sm:$0xff] (!%p237_p10)  ;;  %s1106_s13 = scalar_lea.vmem (!%p237_p10), %s1352_s5, 256  ;;  %s1110_s21 = sshll.u32 (!%p237_p10), %s1189_s14, 4  ;;  %s1111_s21 = int_to_ptr.vmem [resolvable:$false] %s1110_s21 }
  0x15   : > { %1027 = vmatpush3.bf16.msra.mxu1 (!%p237_p10), %v1026_v8  ;;  %p1107_p12 = scmp.ne.s32.totalorder (!%p237_p10), %s1352_s5, %s1106_s13  ;;  %p1113_p1 = scmp.lt.s32.totalorder (!%p237_p10), %s1352_s5, %s1111_s21 }
  0x16   : > { %s288_s11 = scalar_select %p287_p11, %s1176_s18, 1  ;;  %1034 = vmatprep.subr.bf16.mxu1 %v1186_v2 }
  0x17   : > { %s1361_s18 = scalar_lea.sflag [#allocation3], %s284_s12  ;;  %p1108_p13 = pnand %p1107_p12, %p1257_p4 }
  0x18   : > { %s912_s22 = sshll.u32 %s288_s11, 3  ;;  %s948_s24 = sshll.u32 %s288_s11, 4 }
  0x19   : > { %s293_s30 = scalar_lea.vmem %s1407_s0, %s912_s22  ;;  %s302_s7 = scalar_lea.vmem %s1408_s1, %s948_s24 }
  0x1a   : > { %v324_v9 = vld [vmem:[%s293_s30] sm:$0xff]  ;;  %v323_v11 = vld [vmem:[%s302_s7 + $0x8] sm:$0xff]  ;;  %s1357_s11 = scalar_lea.hbm %s1411_s4, %s949_s6  ;;  %p1109_p0 = pneg %p1108_p13 }
  0x1b   : > { %v322_v10 = vld [vmem:[%s302_s7] sm:$0xff]  ;;  %973 = vmatprep.subr.mxu0 %v324_v9  ;;  %s1112_s22 = scalar_lea.vmem %s1111_s21, 512 }
  0x1c   : > { %975 = vmatprep.mubr.msk.f32.mxu0 %vm325_vm0, %v322_v10  ;;  %974 = vmatpush3.msra.mxu0 %v324_v9  ;;  %p1114_p2 = scmp.lt.s32.totalorder %s1112_s22, %s1106_s13 }
  0x1d   : > { %976 = vmatmul.mubr.msk.f32.vlgmr.msra.gmra.mrb[0].mxu0 %vm325_vm0, %v323_v11  ;;  %1028 = vmatprep.subr.bf16.mxu0 %v1186_v2 }
  0x1e   : > { %1030 = vmatpush3.bf16.msra.mxu0 %v1029_v12  ;;  %997 = vmatprep.mubr.msk.f32.mxu0 %vm1187_vm1, %v1188_v16  ;;  %p1115_p3 = por %p1114_p2, %p1113_p1 }
  0x1f   : > { %1031 = vmatprep.subr.bf16.mxu0 %v1186_v2 }
  0x20   : > { %p1116_p5 = pnand %p1115_p3, %p1109_p0 }
  0x22   : > { %1033 = vmatpush3.bf16.msra.mxu0 %v1032_v15 }
  0x23   : > { %1040 = vmatprep.subr.bf16.mxu0 %v1186_v2 }
  0xf0   : > { %v977_v22 = vpop.f32.mrb[0].mxu0 }
  0xf1   : > { %v398_v25 = vpop.f32.mrb[1].mxu0  ;;  %v683_v32 = vrot.slane %v977_v22, 4 }
  0xf2   : > { %v507_v27 = vrot.slane %v398_v25, 4  ;;  %987 = vmatmul.mubr.msk.f32.vlgmr.msra.gmra.mrb[0].mxu1 %vm418_vm2, %v398_v25 }
  0xf3   : > { %1036 = vmatpush3.bf16.msra.mxu1 %v1035_v21  ;;  %1008 = vmatprep.mubr.msk.f32.mxu1 %vm1187_vm1, %v1188_v16 }
  0xf4   : > { %998 = vmatmul.mubr.msk.f32.vlgmr.msra.gmra.mrb[2].mxu0 %vm418_vm2, %v507_v27  ;;  %1037 = vmatprep.subr.bf16.mxu1 %v1186_v2 }
  0xf5   : > { %1042 = vmatpush3.bf16.msra.mxu0 %v1041_v26  ;;  %1019 = vmatprep.mubr.msk.f32.mxu0 %vm1187_vm1, %v1188_v16 }
  0xf6   : > { %1043 = vmatprep.subr.bf16.mxu0 %v1186_v2 }
  0xf7   : > { %1039 = vmatpush3.bf16.msra.mxu1 %v1038_v30 }
  0xf9   : > { %1045 = vmatpush3.bf16.msra.mxu0 %v1044_v31 }
  0xfa   : > { %1009 = vmatmul.mubr.msk.f32.vlgmr.msra.gmra.mrb[2].mxu1 %vm418_vm2, %v977_v22 }
  0xfc   : > { %1020 = vmatmul.mubr.msk.f32.vlgmr.msra.gmra.mrb[4].mxu0 %vm418_vm2, %v683_v32 }
 0x1c5   : > { %v488_v34 = vpop.f32.mrb[0].mxu1 }
 0x1c6   : > { %v489_v36 = vadd.f32 %v917_v33, %v488_v34  ;;  %v988_v37 = vpop.f32.mrb[1].mxu1 }
 0x1c7   : > { %v576_v38 = vpop.f32.mrb[2].mxu0 }
 0x1c8   : > { %493 = vst.msk [vmem:[%s286_s26] sm:$0xf] %vm492_vm3, %v489_v36  ;;  %v577_v39 = vadd.f32 %v924_v35, %v576_v38  ;;  %v999_v40 = vpop.f32.mrb[3].mxu0 }
 0x1ca   : > { %926 = vst.msk [vmem:[%s286_s26 + $0x4] sm:$0xf] %vm492_vm3, %v577_v39 }
 0x1cd   : > { %v664_v42 = vpop.f32.mrb[2].mxu1 }
 0x1ce   : > { %v665_v44 = vadd.f32 %v932_v41, %v664_v42  ;;  %v1010_v45 = vpop.f32.mrb[3].mxu1 }
 0x1cf   : > { %v752_v46 = vpop.f32.mrb[4].mxu0 }
 0x1d0   : > { %934 = vst.msk [vmem:[%s286_s26 + $0x8] sm:$0xf] %vm492_vm3, %v665_v44  ;;  %v753_v47 = vadd.f32 %v940_v43, %v752_v46  ;;  %v1021_v48 = vpop.f32.mrb[5].mxu0 }
 0x1d2   : > { %942 = vst.msk [vmem:[%s286_s26 + $0xc] sm:$0xf] %vm492_vm3, %v753_v47 }
 0x1d3   : > { %1119 = shalt.err (!%p1116_p5)
}
 0x1d4   : > { %s1120_s12 = scalar_lea.hbm %s1357_s11, 256  ;;  %s1124_s29 = scalar_lea.hbm %s1411_s4, 512 }
 0x1d5   : > { %p1121_p6 = scmp.ne.s32.totalorder %s1357_s11, %s1120_s12  ;;  %p1125_p10 = scmp.lt.u32.totalorder %s1357_s11, %s1411_s4 }
 0x1d6   : > { %p1126_p11 = scmp.lt.u32.totalorder %s1124_s29, %s1120_s12  ;;  %p1128_p13 = scmp.lt.u32.totalorder %s1120_s12, %s1357_s11 }
 0x1d7   : > { %p1122_p7 = pnand %p1121_p6, %p1257_p4 }
 0x1d8   : > { %p1127_p12 = por %p1126_p11, %p1125_p10 }
 0x1d9   : > { %p1123_p9 = pneg %p1122_p7 }
 0x1da   : > { %p1129_p0 = por %p1128_p13, %p1127_p12 }
 0x1dc   : > { %p1130_p1 = pnand %p1129_p0, %p1123_p9 }
 0x1de   : > { %1133 = shalt.err (!%p1130_p1)
}
 0x1df   : > { %s1190_s7 = smov 64   ;;  %s1191_s8 = smov 4  }
 0x1e0   : > { %1046 = dma.vmem_to_hbm [thread:$0]  (%p1257_p4), %s1352_s5, 256, %s1357_s11, %s1361_s18, %s1190_s7, %s1190_s7, %s1191_s8  }
 0x1e1 PF: > { %p1052_p2 = scmp.ge.s32.totalorder %s1184_s20, 2  ;;  %s789_s9 = sand.u32 1, %s1164_s15  }
 0x1e2   : > { %s790_s10 = scalar_lea.sflag [#allocation3], %s789_s9 }
 0x1e3   : > { %p1049_p3 = pnand %p1052_p2, %p1264_p8 }
 0x1e5   : > { %1159 = dma.done.wait (!%p1049_p3), %s790_s10, 256  }
 0x1e6   : > { %1161 = vsyncadd (!%p1049_p3), %s790_s10, 4294967040  ;;  %s17_s20 = sadd.s32 1, %s1184_s20   ;;  %s1414_s15 = smov %s1168_s16 }
 0x1e7   : > { %p14_p5 = scmp.ge.s32.totalorder %s17_s20, 4   ;;  %s1415_s16 = smov %s1172_s17 }
 0x1e8   : > { %s1416_s17 = smov %s1270_s28  ;;  %s1417_s18 = smov %s1180_s19 }
 0x1e9   : > { %s1418_s19 = smov %s1420_s23  ;;  %16 = sbr.rel (!%p14_p5) target bundleno = 4 (0x4), region = 89 }
 0x1f0   :  { %795 = vsyncpa [#allocation3], 1 }
 0x1f1   :  { %797 = vsyncpa [#allocation3 + $0x1], 1 }

</bundles_post_ra>
